<compile_context>
chip_gen: v5e
topology: v5e:2x2
jax: 0.10.0
libtpu: 0.0.40
codegen_flags: <defaults>
</compile_context>

<pallas_src>
import math

import jax
import jax.numpy as jnp
from jax.experimental import pallas as pl
from jax.experimental.pallas import tpu as pltpu

_LANE = 128
_SUBLANE = 8
_MAX_TILE_BYTES = 4 * 1024 * 1024   # per-stream per-buffer cap (past ~2 MiB gains are marginal)


# ---------------------------------------------------------------------------
# Small helpers
# ---------------------------------------------------------------------------
def _round_up(n, m):
    return ((n + m - 1) // m) * m


def _pad_last(a, target):
    pad = target - a.shape[-1]
    if pad == 0:
        return a
    return jnp.pad(a, [(0, 0)] * (a.ndim - 1) + [(0, pad)])


def _sublane_mult(dtype):
    # second-to-last block dim granularity: f32 -> 8, bf16 -> 16, int8/fp8 -> 32
    return max(_SUBLANE, 32 // max(jnp.dtype(dtype).itemsize, 1))


def _vmem_capacity_bytes():
    try:
        return int(pltpu.get_tpu_info().vmem_capacity_bytes)
    except Exception:
        return 64 * 1024 * 1024      # conservative default (v7x per-TC VMEM)


def _per_tile_budget(n_streams, vmem_cap):
    # Keep all pipelined x tiles (n_streams * 2 double-buffers) within ~half of VMEM.
    return max(64 * 1024, min(_MAX_TILE_BYTES, (vmem_cap // 2) // (2 * n_streams)))


def _pick_b(B):
    # Batch tile ("parallel" axis, megacore-shardable). Pad B>8 to a multiple of 8
    # so nb >= 2 whenever B >= 16 (keeps both v7x TensorCores busy).
    B_pad = B if B <= _SUBLANE else _round_up(B, _SUBLANE)
    b_tile = B_pad if B_pad <= _SUBLANE else _SUBLANE
    return B_pad, b_tile


def _pick_s(S_r, b_tile, Dk, itemsize, budget_bytes, sub):
    # Time-tile (in units of grouped frames) from a per-buffer byte budget.
    bytes_per_row = max(1, b_tile * Dk * itemsize)
    t = max(sub, (int(budget_bytes // bytes_per_row) // sub) * sub)
    if t >= S_r:
        t = _round_up(S_r, sub)      # single pass over the (padded) time axis
    S_r_pad = _round_up(S_r, t)      # zero-frame padding; harmless for the folded mean
    return t, S_r_pad


def _densify(x, k, B_pad, S_r_pad):
    # Lane-densify: (B, S, Din) -> (B_pad, S_r_pad, k*Din), with k*Din % 128 == 0.
    # Plain row-major reshape (groups of k consecutive frames become one row).
    # Zero-padded batch rows / frames contribute 0 to the running sum; the 1/S
    # mean factor is folded into the weights using the true S.
    B, S, Din = x.shape
    pad_b, pad_s = B_pad - B, S_r_pad * k - S
    if pad_b or pad_s:
        x = jnp.pad(x, ((0, pad_b), (0, pad_s), (0, 0)))
    return x.reshape(B_pad, S_r_pad, k * Din)


def _vmem_limit(n_streams, tile_bytes, weight_bytes, acc_bytes, out_bytes, vmem_cap):
    # Pipelined x tiles (x2 buffers), weights/bias blocks (assume x2), accumulators,
    # output block (x2), plus 25% + 2 MiB headroom, clamped to the chip's VMEM.
    need = n_streams * 2 * tile_bytes + 2 * weight_bytes + acc_bytes + 2 * out_bytes
    need = int(need * 1.25) + (2 << 20)
    return int(min(max(need, 16 << 20), max(vmem_cap - (8 << 20), 16 << 20)))


# ---------------------------------------------------------------------------
# Kernels
# ---------------------------------------------------------------------------
def _genre_kernel(x_ref, wf_ref, bf_ref, out_ref, acc_ref):
    # x:   (b_tile, s_tile_r, Dk)  lane-dense streamed tile (Dk % 128 == 0)
    # wf:  (Dk, G_pad)             folded  tile_k(wb @ wg) / S (zero-padded lanes)
    # bf:  (1, G_pad)              folded  bb @ wg + bg
    # acc: (b_tile, Dk) f32        running sum over grouped frames
    s = pl.program_id(1)

    @pl.when(s == 0)
    def _():
        acc_ref[...] = jnp.zeros_like(acc_ref)

    acc_ref[...] += jnp.sum(x_ref[...].astype(jnp.float32), axis=1)

    @pl.when(s == pl.num_programs(1) - 1)
    def _():
        out_ref[...] = (
            jnp.dot(acc_ref[...], wf_ref[...], preferred_element_type=jnp.float32)
            + bf_ref[...]
        )


def _similarity_kernel(xa_ref, xb_ref, w1_ref, b1_ref, w2_ref, b2_ref,
                       out_ref, acc_a, acc_b):
    # xa/xb: (b_tile, s_tile_r, Dk) lane-dense streamed tiles
    # w1:    (2*Dk, H_pad)  vstack(tile_k(wb @ w1[:E]), tile_k(wb @ w1[E:])) / S
    # b1:    (1, H_pad)     folded bias
    # w2:    (H_pad, O_pad) zero-padded,  b2: (1, O_pad)
    s = pl.program_id(1)

    @pl.when(s == 0)
    def _():
        acc_a[...] = jnp.zeros_like(acc_a)
        acc_b[...] = jnp.zeros_like(acc_b)

    acc_a[...] += jnp.sum(xa_ref[...].astype(jnp.float32), axis=1)
    acc_b[...] += jnp.sum(xb_ref[...].astype(jnp.float32), axis=1)

    @pl.when(s == pl.num_programs(1) - 1)
    def _():
        combined = jnp.concatenate([acc_a[...], acc_b[...]], axis=-1)
        h = jnp.dot(combined, w1_ref[...], preferred_element_type=jnp.float32) + b1_ref[...]
        h = jnp.maximum(h, 0.0)  # ReLU
        out_ref[...] = (
            jnp.dot(h, w2_ref[...], preferred_element_type=jnp.float32) + b2_ref[...]
        )


# ---------------------------------------------------------------------------
# Wrappers
# ---------------------------------------------------------------------------
def genre_forward(params, x_a, *, tile_budget_bytes=None):
    B, S, Din = x_a.shape
    G = params["wg"].shape[1]
    G_pad = _round_up(G, _LANE)
    itemsize = jnp.dtype(x_a.dtype).itemsize
    sub = _sublane_mult(x_a.dtype)

    k = _LANE // math.gcd(Din, _LANE)   # smallest k with (k*Din) % 128 == 0
    Dk = k * Din
    S_r = -(-S // k)

    B_pad, b_tile = _pick_b(B)
    vmem_cap = _vmem_capacity_bytes()
    if tile_budget_bytes is None:
        tile_budget_bytes = _per_tile_budget(n_streams=1, vmem_cap=vmem_cap)
    s_tile_r, S_r_pad = _pick_s(S_r, b_tile, Dk, itemsize, tile_budget_bytes, sub)
    nb, ns = B_pad // b_tile, S_r_pad // s_tile_r

    x_r = _densify(x_a, k, B_pad, S_r_pad)

    # Fold backbone projection + classifier + 1/S mean into a single matmul,
    # vertically tiled k times to match the lane-dense grouped-frame rows.
    w_fold = (params["wb"] @ params["wg"]).astype(jnp.float32) * (1.0 / S)     # (Din, G)
    b_fold = (params["bb"] @ params["wg"] + params["bg"]).astype(jnp.float32)  # (1, G)
    w_fold = _pad_last(jnp.tile(w_fold, (k, 1)), G_pad)                        # (Dk, G_pad)
    b_fold = _pad_last(b_fold, G_pad)                                          # (1, G_pad)

    tile_bytes = b_tile * s_tile_r * Dk * itemsize
    weight_bytes = (w_fold.size + b_fold.size) * 4
    acc_bytes = b_tile * Dk * 4
    out_bytes = b_tile * G_pad * 4
    vmem_limit = _vmem_limit(1, tile_bytes, weight_bytes, acc_bytes, out_bytes, vmem_cap)

    flops = int(2 * B_pad * S_r_pad * Dk + 2 * B_pad * Dk * G_pad)
    bytes_accessed = int(x_r.size * itemsize + weight_bytes + B_pad * G_pad * 4)

    # NOTE: weight/bias blocks have constant index_maps; Mosaic keeps them
    # resident, so no explicit pipeline_mode override is needed.
    out_pad = pl.pallas_call(
        _genre_kernel,
        out_shape=jax.ShapeDtypeStruct((B_pad, G_pad), jnp.float32),
        grid=(nb, ns),
        in_specs=[
            pl.BlockSpec((b_tile, s_tile_r, Dk), lambda i, s: (i, s, 0)),
            pl.BlockSpec((Dk, G_pad), lambda i, s: (0, 0)),
            pl.BlockSpec((1, G_pad), lambda i, s: (0, 0)),
        ],
        out_specs=pl.BlockSpec((b_tile, G_pad), lambda i, s: (i, 0)),
        scratch_shapes=[pltpu.VMEM((b_tile, Dk), jnp.float32)],
        compiler_params=pltpu.CompilerParams(
            dimension_semantics=("parallel", "arbitrary"),
            vmem_limit_bytes=vmem_limit),
        cost_estimate=pl.CostEstimate(
            flops=flops, transcendentals=0, bytes_accessed=bytes_accessed),
    )(x_r, w_fold, b_fold)
    return out_pad[:B, :G]


def similarity_forward(params, x_a, x_b, *, tile_budget_bytes=None):
    B, S, Din = x_a.shape
    E = params["wb"].shape[1]
    H = params["w1"].shape[1]
    H_pad = _round_up(H, _LANE)
    O_pad = _LANE
    itemsize = jnp.dtype(x_a.dtype).itemsize
    sub = _sublane_mult(x_a.dtype)

    k = _LANE // math.gcd(Din, _LANE)
    Dk = k * Din
    S_r = -(-S // k)

    B_pad, b_tile = _pick_b(B)
    vmem_cap = _vmem_capacity_bytes()
    if tile_budget_bytes is None:
        tile_budget_bytes = _per_tile_budget(n_streams=2, vmem_cap=vmem_cap)
    s_tile_r, S_r_pad = _pick_s(S_r, b_tile, Dk, itemsize, tile_budget_bytes, sub)
    nb, ns = B_pad // b_tile, S_r_pad // s_tile_r

    xa_r = _densify(x_a, k, B_pad, S_r_pad)
    xb_r = _densify(x_b, k, B_pad, S_r_pad)

    inv_s = 1.0 / S
    # Fold backbone + concat-split of the first similarity linear + 1/S mean,
    # then stack into ONE weight so the finalize is a single K=2*Dk matmul.
    w1a = jnp.tile((params["wb"] @ params["w1"][:E, :]).astype(jnp.float32) * inv_s, (k, 1))
    w1b = jnp.tile((params["wb"] @ params["w1"][E:, :]).astype(jnp.float32) * inv_s, (k, 1))
    w1_cat = _pad_last(jnp.concatenate([w1a, w1b], axis=0), H_pad)              # (2*Dk, H_pad)
    b1f = _pad_last((params["bb"] @ params["w1"][:E, :]
                     + params["bb"] @ params["w1"][E:, :]
                     + params["b1"]).astype(jnp.float32), H_pad)                # (1, H_pad)
    w2p = params["w2"].astype(jnp.float32)
    w2p = jnp.pad(w2p, ((0, H_pad - w2p.shape[0]), (0, O_pad - w2p.shape[1])))  # (H_pad, 128)
    b2p = _pad_last(params["b2"].astype(jnp.float32), O_pad)                    # (1, 128)

    tile_bytes = b_tile * s_tile_r * Dk * itemsize
    weight_bytes = (w1_cat.size + b1f.size + w2p.size + b2p.size) * 4
    acc_bytes = 2 * b_tile * Dk * 4
    out_bytes = b_tile * O_pad * 4
    vmem_limit = _vmem_limit(2, tile_bytes, weight_bytes, acc_bytes, out_bytes, vmem_cap)

    flops = int(4 * B_pad * S_r_pad * Dk + 4 * B_pad * Dk * H_pad + 2 * B_pad * H_pad * O_pad)
    bytes_accessed = int(2 * xa_r.size * itemsize + weight_bytes + B_pad * O_pad * 4)

    out_pad = pl.pallas_call(
        _similarity_kernel,
        out_shape=jax.ShapeDtypeStruct((B_pad, O_pad), jnp.float32),
        grid=(nb, ns),
        in_specs=[
            pl.BlockSpec((b_tile, s_tile_r, Dk), lambda i, s: (i, s, 0)),
            pl.BlockSpec((b_tile, s_tile_r, Dk), lambda i, s: (i, s, 0)),
            pl.BlockSpec((2 * Dk, H_pad), lambda i, s: (0, 0)),
            pl.BlockSpec((1, H_pad), lambda i, s: (0, 0)),
            pl.BlockSpec((H_pad, O_pad), lambda i, s: (0, 0)),
            pl.BlockSpec((1, O_pad), lambda i, s: (0, 0)),
        ],
        out_specs=pl.BlockSpec((b_tile, O_pad), lambda i, s: (i, 0)),
        scratch_shapes=[
            pltpu.VMEM((b_tile, Dk), jnp.float32),
            pltpu.VMEM((b_tile, Dk), jnp.float32),
        ],
        compiler_params=pltpu.CompilerParams(
            dimension_semantics=("parallel", "arbitrary"),
            vmem_limit_bytes=vmem_limit),
        cost_estimate=pl.CostEstimate(
            flops=flops, transcendentals=0, bytes_accessed=bytes_accessed),
    )(xa_r, xb_r, w1_cat, b1f, w2p, b2p)
    return out_pad[:B, :1]


def genre_plagiarism_forward(params, x_a, x_b=None, **kw):
    if x_b is None:
        return genre_forward(params, x_a, **kw)
    return similarity_forward(params, x_a, x_b, **kw)


# ---------------------------------------------------------------------------
# Deterministic parameter construction (shapes follow the PyTorch __init__)
# ---------------------------------------------------------------------------
def init_params(key, d_in, embed_dim, num_genres, sim_hidden=256):
    ks = jax.random.split(key, 8)
    scale = lambda fan_in: 1.0 / jnp.sqrt(jnp.float32(fan_in))
    return {
        # synthetic linear backbone: D_in -> embed_dim (per time-frame)
        "wb": jax.random.normal(ks[0], (d_in, embed_dim), jnp.float32) * scale(d_in),
        "bb": jax.random.normal(ks[1], (1, embed_dim), jnp.float32) * 0.01,
        # genre_classifier: Linear(embed_dim, num_genres)
        "wg": jax.random.normal(ks[2], (embed_dim, num_genres), jnp.float32) * scale(embed_dim),
        "bg": jax.random.normal(ks[3], (1, num_genres), jnp.float32) * 0.01,
        # similarity_fc: Linear(2*embed_dim, 256) -> ReLU -> Linear(256, 1)
        "w1": jax.random.normal(ks[4], (2 * embed_dim, sim_hidden), jnp.float32) * scale(2 * embed_dim),
        "b1": jax.random.normal(ks[5], (1, sim_hidden), jnp.float32) * 0.01,
        "w2": jax.random.normal(ks[6], (sim_hidden, 1), jnp.float32) * scale(sim_hidden),
        "b2": jax.random.normal(ks[7], (1, 1), jnp.float32) * 0.01,
    }


# ---------------------------------------------------------------------------
# Pure-JAX reference (for correctness check)
# ---------------------------------------------------------------------------
def _ref_encode(params, x):
    hidden = jnp.einsum("bsd,de->bse", x, params["wb"]) + params["bb"][None]
    return hidden.mean(axis=1)


def _ref_forward(params, x_a, x_b=None):
    if x_b is None:
        emb = _ref_encode(params, x_a)
        return emb @ params["wg"] + params["bg"]
    emb_a = _ref_encode(params, x_a)
    emb_b = _ref_encode(params, x_b)
    combined = jnp.concatenate([emb_a, emb_b], axis=1)
    h = jnp.maximum(combined @ params["w1"] + params["b1"], 0.0)
    return h @ params["w2"] + params["b2"]


# ---------------------------------------------------------------------------
if __name__ == "__main__":
    B, S, D_IN = 2, 64, 32          # batch, time-frames, feature-dim
    EMBED_DIM, NUM_GENRES = 32, 8

    key = jax.random.PRNGKey(0)
    k_params, k_a, k_b = jax.random.split(key, 3)

    params = init_params(k_params, D_IN, EMBED_DIM, NUM_GENRES)
    x_a = jax.random.normal(k_a, (B, S, D_IN), jnp.float32)
    x_b = jax.random.normal(k_b, (B, S, D_IN), jnp.float32)

    ref_logits = _ref_forward(params, x_a)
    ref_score = _ref_forward(params, x_a, x_b)

    # Branch 1: genre classification (single input)
    genre_logits = genre_plagiarism_forward(params, x_a)
    jax.block_until_ready(genre_logits)

    # Branch 2: plagiarism / similarity score (pair input)
    sim_score = genre_plagiarism_forward(params, x_a, x_b)
    jax.block_until_ready(sim_score)

    assert genre_logits.shape == (B, NUM_GENRES)
    assert sim_score.shape == (B, 1)
    assert jnp.allclose(genre_logits, ref_logits, atol=2e-4, rtol=2e-4)
    assert jnp.allclose(sim_score, ref_score, atol=2e-4, rtol=2e-4)

    # Force a multi-step S reduction (tiny per-tile budget -> s_tile_r=8, ns=2)
    # to exercise the pl.when init / accumulate / finalize path.
    genre_logits_t = genre_plagiarism_forward(params, x_a, tile_budget_bytes=8192)
    sim_score_t = genre_plagiarism_forward(params, x_a, x_b, tile_budget_bytes=8192)
    jax.block_until_ready((genre_logits_t, sim_score_t))
    assert jnp.allclose(genre_logits_t, ref_logits, atol=2e-4, rtol=2e-4)
    assert jnp.allclose(sim_score_t, ref_score, atol=2e-4, rtol=2e-4)

    print("KERNEL_OK")
</pallas_src>

<mosaic_0001>
module attributes {stable_mosaic.version = 11 : i64} {
  func.func @_genre_kernel(%arg0: i32, %arg1: i32, %arg2: memref<2x16x128xf32, #tpu.memory_space<vmem>>, %arg3: memref<128x128xf32, #tpu.memory_space<vmem>>, %arg4: memref<1x128xf32, #tpu.memory_space<vmem>>, %arg5: memref<2x128xf32, #tpu.memory_space<vmem>>, %arg6: memref<2x128xf32, #tpu.memory_space<vmem>>) attributes {dimension_semantics = [#tpu.dimension_semantics<parallel>, #tpu.dimension_semantics<arbitrary>], iteration_bounds = array<i64: 1, 1>, scalar_prefetch = 0 : i64, scratch_operands = 1 : i64, tpu.core_type = #tpu.core_type<tc>, window_params = [{transform_indices = @transform_0, window_bounds = array<i64: 2, 16, 128>}, {pipeline_mode = #tpu.pipeline_mode<synchronous>, transform_indices = @transform_1, window_bounds = array<i64: 128, 128>}, {pipeline_mode = #tpu.pipeline_mode<synchronous>, transform_indices = @transform_2, window_bounds = array<i64: 1, 128>}, {transform_indices = @transform_3, window_bounds = array<i64: 2, 128>}]} {
    %c0_i32 = arith.constant 0 : i32
    %0 = arith.cmpi eq, %arg1, %c0_i32 : i32
    %1 = arith.extui %0 : i1 to i32
    %c0_i32_0 = arith.constant 0 : i32
    %2 = arith.cmpi ne, %1, %c0_i32_0 : i32
    scf.if %2 {
      %cst_9 = arith.constant 0.000000e+00 : f32
      %11 = vector.broadcast %cst_9 : f32 to vector<2x128xf32>
      %c0_10 = arith.constant 0 : index
      %c0_11 = arith.constant 0 : index
      %12 = vector.load %arg6[%c0_10, %c0_11] : memref<2x128xf32, #tpu.memory_space<vmem>>, vector<2x128xf32>
      tpu.vector_store %arg6[%c0_10, %c0_11], %11 {strides = array<i32>} : memref<2x128xf32, #tpu.memory_space<vmem>>, vector<2x128xf32>,
    } else {
    }
    %c0 = arith.constant 0 : index
    %c0_1 = arith.constant 0 : index
    %3 = vector.load %arg6[%c0, %c0_1] : memref<2x128xf32, #tpu.memory_space<vmem>>, vector<2x128xf32>
    %c0_2 = arith.constant 0 : index
    %c0_3 = arith.constant 0 : index
    %c0_4 = arith.constant 0 : index
    %4 = vector.load %arg2[%c0_2, %c0_3, %c0_4] : memref<2x16x128xf32, #tpu.memory_space<vmem>>, vector<2x16x128xf32>
    %cst = arith.constant dense<0.000000e+00> : vector<2x128xf32>
    %5 = vector.multi_reduction <add>, %4, %cst [1] : vector<2x16x128xf32> to vector<2x128xf32>
    %6 = arith.addf %3, %5 : vector<2x128xf32>
    %c0_5 = arith.constant 0 : index
    %c0_6 = arith.constant 0 : index
    %7 = vector.load %arg6[%c0_5, %c0_6] : memref<2x128xf32, #tpu.memory_space<vmem>>, vector<2x128xf32>
    tpu.vector_store %arg6[%c0_5, %c0_6], %6 {strides = array<i32>} : memref<2x128xf32, #tpu.memory_space<vmem>>, vector<2x128xf32>,
    %c0_i32_7 = arith.constant 0 : i32
    %8 = arith.cmpi eq, %arg1, %c0_i32_7 : i32
    %9 = arith.extui %8 : i1 to i32
    %c0_i32_8 = arith.constant 0 : i32
    %10 = arith.cmpi ne, %9, %c0_i32_8 : i32
    scf.if %10 {
      %c0_9 = arith.constant 0 : index
      %c0_10 = arith.constant 0 : index
      %11 = vector.load %arg6[%c0_9, %c0_10] : memref<2x128xf32, #tpu.memory_space<vmem>>, vector<2x128xf32>
      %c0_11 = arith.constant 0 : index
      %c0_12 = arith.constant 0 : index
      %12 = vector.load %arg3[%c0_11, %c0_12] : memref<128x128xf32, #tpu.memory_space<vmem>>, vector<128x128xf32>
      %cst_13 = arith.constant dense<0.000000e+00> : vector<2x128xf32>
      %13 = tpu.matmul %11, %12, %cst_13 {dimension_numbers = #tpu.dot_dimension_numbers<[1], [0], [0], [1], [0, 0, 1, 1], [], []>} : vector<2x128xf32>, vector<128x128xf32>, vector<2x128xf32> -> vector<2x128xf32>
      %c0_14 = arith.constant 0 : index
      %c0_15 = arith.constant 0 : index
      %14 = vector.load %arg4[%c0_14, %c0_15] : memref<1x128xf32, #tpu.memory_space<vmem>>, vector<1x128xf32>
      %15 = vector.broadcast %14 : vector<1x128xf32> to vector<2x128xf32>
      %16 = arith.addf %13, %15 : vector<2x128xf32>
      %c0_16 = arith.constant 0 : index
      %c0_17 = arith.constant 0 : index
      %17 = vector.load %arg5[%c0_16, %c0_17] : memref<2x128xf32, #tpu.memory_space<vmem>>, vector<2x128xf32>
      tpu.vector_store %arg5[%c0_16, %c0_17], %16 {strides = array<i32>} : memref<2x128xf32, #tpu.memory_space<vmem>>, vector<2x128xf32>,
    } else {
    }
    return
  }
  func.func @transform_0(%arg0: i32, %arg1: i32) -> (i32, i32, i32) {
    %c0_i32 = arith.constant 0 : i32
    %c0_i32_0 = arith.constant 0 : i32
    return %arg0, %arg1, %c0_i32 : i32, i32, i32
  }
  func.func @transform_1(%arg0: i32, %arg1: i32) -> (i32, i32) {
    %c0_i32 = arith.constant 0 : i32
    %c0_i32_0 = arith.constant 0 : i32
    %c0_i32_1 = arith.constant 0 : i32
    return %c0_i32, %c0_i32_0 : i32, i32
  }
  func.func @transform_2(%arg0: i32, %arg1: i32) -> (i32, i32) {
    %c0_i32 = arith.constant 0 : i32
    %c0_i32_0 = arith.constant 0 : i32
    %c0_i32_1 = arith.constant 0 : i32
    return %c0_i32, %c0_i32_0 : i32, i32
  }
  func.func @transform_3(%arg0: i32, %arg1: i32) -> (i32, i32) {
    %c0_i32 = arith.constant 0 : i32
    %c0_i32_0 = arith.constant 0 : i32
    return %arg0, %c0_i32 : i32, i32
  }
}

</mosaic_0001>

<bundles_post_ra>
// kernel: tpu_custom_call.1
= control target key start
LH: loop header
LB: loop body
LE: loop exit
PB: predicated region body
PF: predicated region fallthrough
CT: control target
= control target key end

     0   :  { %8 = vsyncpa [#allocation4], 0  ;;  %s264_s0 = inlined_call_operand.hbm [shape: f32[2,16,128], index: 0, kind: input, shape index: {}]   ;;  %s265_s1 = inlined_call_operand.hbm [shape: f32[128,128], index: 1, kind: input, shape index: {}]   ;;  %s266_s2 = inlined_call_operand.vmem [shape: f32[1,128], index: 2, kind: input, shape index: {}]   ;;  %s267_s3 = inlined_call_operand.hbm [shape: f32[2,128], index: 3, kind: output, shape index: {}]  }
   0x1   :  { %9 = vsyncpa [#allocation7], 0 }
   0x2   :  { %10 = vsyncpa [#allocation5], 0  ;;  %s15_s14 = sshll.u32 %s264_s0, 4  ;;  %s226_s15 = smov [#allocation3]   ;;  %s16_s14 = int_to_ptr.hbm [resolvable:$true] %s15_s14 }
   0x3   :  { %s17_s16 = sshll.u32 %s226_s15, 4  ;;  %s28_s19 = sshll.u32 %s265_s1, 4  ;;  %s18_s16 = int_to_ptr.vmem [resolvable:$true] %s17_s16  ;;  %s29_s19 = int_to_ptr.hbm [resolvable:$true] %s28_s19 }
   0x4   :  { %s227_s20 = smov 128   ;;  %s228_s21 = smov 8  }
   0x5   :  { %23 = dma.hbm_to_vmem [thread:$0]  %s16_s14, 512, %s18_s16, [#allocation4], %s227_s20, %s227_s20, %s228_s21  }
   0x6   :  { %s229_s22 = smov [#allocation6]  }
   0x7   :  { %s30_s23 = sshll.u32 %s229_s22, 4  ;;  %s31_s23 = int_to_ptr.vmem [resolvable:$true] %s30_s23 }
   0x8   :  { %36 = dma.hbm_to_vmem [thread:$0]  %s29_s19, 2048, %s31_s23, [#allocation7], %s227_s20, %s227_s20, %s228_s21  }
   0x9   :  { %220 = dma.done.wait [#allocation4], 512  }
   0xa   :  { %221 = vsyncadd [#allocation4], 4294966784 }
   0xb   :  { %222 = dma.done.wait [#allocation7], 2048  }
   0xc   :  { %223 = vsyncadd [#allocation7], 4294965248  ;;  %v230_v0 = vmov 0.0   ;;  %v97_v1 = vld [vmem:[#allocation6 + $0x78] sm:$0xff]  ;;  %v96_v2 = vld [vmem:[#allocation6 + $0x70] sm:$0xff]  ;;  %vm73_vm0 = vcmask 1041409  }
   0xd   :  { %51 = vst [vmem:[#allocation2] sm:$0x3] %v230_v0  ;;  %102 = vmatpush.msra.mxu0 %v97_v1  ;;  %v95_v3 = vld [vmem:[#allocation6 + $0x68] sm:$0xff]  ;;  %v94_v4 = vld [vmem:[#allocation6 + $0x60] sm:$0xff]  ;;  %v93_v5 = vld [vmem:[#allocation6 + $0x58] sm:$0xff]  ;;  %s231_s24 = smov [#allocation8]  }
   0xe   :  { %v53_v6 = vld [vmem:[#allocation3] sm:$0xff]  ;;  %v54_v7 = vld [vmem:[#allocation3 + $0x8] sm:$0xff]  ;;  %v55_v8 = vld [vmem:[#allocation3 + $0x10] sm:$0xff]  ;;  %s128_s25 = sshll.u32 %s231_s24, 4  ;;  %s130_s28 = sshll.u32 %s267_s3, 4  ;;  %s129_s25 = int_to_ptr.vmem [resolvable:$true] %s128_s25  ;;  %s131_s28 = int_to_ptr.hbm [resolvable:$true] %s130_s28 }
   0xf   :  { %103 = vmatpush.msra.mxu0 %v96_v2  ;;  %v56_v9 = vld [vmem:[#allocation3 + $0x18] sm:$0xff]  ;;  %v57_v10 = vadd.f32 %v54_v7, %v53_v6  ;;  %v92_v12 = vld [vmem:[#allocation6 + $0x50] sm:$0xff]  ;;  %v91_v15 = vld [vmem:[#allocation6 + $0x48] sm:$0xff] }
  0x10   :  { %v64_v11 = vadd.f32 %v56_v9, %v55_v8  ;;  %v90_v18 = vld [vmem:[#allocation6 + $0x40] sm:$0xff]  ;;  %v89_v21 = vld [vmem:[#allocation6 + $0x38] sm:$0xff]  ;;  %v88_v24 = vld [vmem:[#allocation6 + $0x30] sm:$0xff] }
  0x11   :  { %104 = vmatpush.msra.mxu0 %v95_v3  ;;  %v58_v13 = vrot.slane %v57_v10, 4  ;;  %v87_v27 = vld [vmem:[#allocation6 + $0x28] sm:$0xff]  ;;  %v86_v31 = vld [vmem:[#allocation6 + $0x20] sm:$0xff]  ;;  %v85_v33 = vld [vmem:[#allocation6 + $0x18] sm:$0xff] }
  0x12   :  { %v65_v14 = vrot.slane %v64_v11, 4  ;;  %v84_v35 = vld [vmem:[#allocation6 + $0x10] sm:$0xff]  ;;  %v83_v36 = vld [vmem:[#allocation6 + $0x8] sm:$0xff]  ;;  %v82_v37 = vld [vmem:[#allocation6] sm:$0xff] }
  0x13   :  { %105 = vmatpush.msra.mxu0 %v94_v4  ;;  %v59_v16 = vadd.f32 %v58_v13, %v57_v10  ;;  %v147_v39 = vld [vmem:[%s266_s2] ss:$0 sm:$0xff] }
  0x14   :  { %v66_v17 = vadd.f32 %v65_v14, %v64_v11  ;;  %v52_v28 = vld [vmem:[#allocation2] sm:$0x3] }
  0x15   :  { %106 = vmatpush.msra.mxu0 %v93_v5  ;;  %v60_v19 = vrot.slane %v59_v16, 2 }
  0x16   :  { %v67_v20 = vrot.slane %v66_v17, 2 }
  0x17   :  { %107 = vmatpush.msra.mxu0 %v92_v12  ;;  %v61_v22 = vadd.f32 %v60_v19, %v59_v16 }
  0x18   :  { %v68_v23 = vadd.f32 %v67_v20, %v66_v17 }
  0x19   :  { %108 = vmatpush.msra.mxu0 %v91_v15  ;;  %v62_v25 = vrot.slane %v61_v22, 1 }
  0x1a   :  { %v69_v26 = vrot.slane %v68_v23, 1 }
  0x1b   :  { %109 = vmatpush.msra.mxu0 %v90_v18  ;;  %v63_v29 = vadd.f32 %v62_v25, %v61_v22 }
  0x1c   :  { %v70_v30 = vadd.f32 %v69_v26, %v68_v23 }
  0x1d   :  { %110 = vmatpush.msra.mxu0 %v89_v21 }
  0x1e   :  { %v74_v32 = vsel %vm73_vm0, %v70_v30, %v63_v29 }
  0x1f   :  { %111 = vmatpush.msra.mxu0 %v88_v24  ;;  %v76_v34 = vadd.f32 %v74_v32, %v52_v28 }
  0x21   :  { %112 = vmatpush.msra.mxu0 %v87_v27  ;;  %77 = vst [vmem:[#allocation2] sm:$0x3] %v76_v34 }
  0x23   :  { %113 = vmatpush.msra.mxu0 %v86_v31 }
  0x25   :  { %114 = vmatpush.msra.mxu0 %v85_v33 }
  0x27   :  { %115 = vmatpush.msra.mxu0 %v84_v35 }
  0x28   :  { %v81_v38 = vld [vmem:[#allocation2] sm:$0x3] }
  0x29   :  { %116 = vmatpush.msra.mxu0 %v83_v36 }
  0x2b   :  { %117 = vmatpush.msra.mxu0 %v82_v37 }
  0x2c   :  { %118 = vmatmul.f32.vlgmr.msra.gmra.mxu0 %v81_v38 }
  0xa9   :  { %v119_v40 = vpop.f32.mrf.mxu0 }
  0xaa   :  { %v120_v41 = vadd.f32 %v147_v39, %v119_v40 }
  0xac   :  { %122 = vst [vmem:[#allocation8] sm:$0x3] %v120_v41 }
  0xad   :  { %133 = dma.vmem_to_hbm [thread:$0]  %s129_s25, 32, %s131_s28, [#allocation5]  }
  0xae   :  { %224 = dma.done.wait [#allocation5], 32  }
  0xaf   :  { %225 = vsyncadd [#allocation5], 4294967264 }
  0xb0   :  { %138 = vsyncpa [#allocation4], 1 }
  0xb1   :  { %139 = vsyncpa [#allocation7], 1 }
  0xb2   :  { %140 = vsyncpa [#allocation5], 1 }

</bundles_post_ra>
